<compile_context>
chip_gen: v5e
topology: v5e:2x2
jax: 0.10.0
libtpu: 0.0.40
codegen_flags: <defaults>
</compile_context>

<pallas_src>
import numpy as np
import jax
import jax.numpy as jnp
from jax.experimental import pallas as pl
from jax.experimental.pallas import tpu as pltpu


def posenc_kernel(x_ref, pe_ref, o_ref):
    # x_ref / o_ref: (TS, B, TD) VMEM tiles; pe_ref: (TS, 1, TD).
    # The size-1 batch axis of pe broadcasts on the VPU (sublane broadcast, free).
    # pe stays in its own dtype (float32 table == the PyTorch buffer); the promote +
    # cast-back is free VPU work in this DMA-bound kernel.
    o_ref[...] = (x_ref[...] + pe_ref[...]).astype(o_ref.dtype)


def make_pe(max_len, d_model, dtype=jnp.float32):
    """Sinusoidal table identical to the PyTorch __init__; shape (max_len, 1, d_model)."""
    position = np.arange(max_len, dtype=np.float32)[:, None]                   # (L, 1)
    div_term = np.exp(np.arange(0, d_model, 2, dtype=np.float32)
                      * (-np.log(10000.0) / d_model))                          # (D/2,)
    pe = np.zeros((max_len, d_model), dtype=np.float32)
    pe[:, 0::2] = np.sin(position * div_term)
    pe[:, 1::2] = np.cos(position * div_term)
    return jnp.asarray(pe[:, None, :], dtype)                                  # (L, 1, D)


def _round_up(x, m):
    return (x + m - 1) // m * m


def _sublanes(itemsize):
    # VMEM sublane packing: 8 rows for 32-bit, 16 for 16-bit, 32 for 8-bit dtypes.
    return max(8, 32 // max(1, itemsize))


def _vmem_capacity():
    try:
        return int(pltpu.get_tpu_info().vmem_capacity_bytes)
    except Exception:
        return 64 * 1024 * 1024   # v7x physical VMEM; conservative everywhere else


def _num_tensorcores():
    # v7x has 2 TensorCores per chip; v5e/v6e have 1.  Probe defensively so missing
    # fields / older JAX never break compilation (falls back to 1).
    try:
        info = pltpu.get_tpu_info()
        for name in ("tensorcore_count", "num_tensorcores", "num_cores", "core_count"):
            v = getattr(info, name, None)
            if isinstance(v, int) and v > 1:
                return v
    except Exception:
        pass
    return 1


def _row_bytes(B, td, x_itemsize, pe_itemsize):
    """VMEM bytes of one sequence row of the working set (x tile + out tile + pe tile),
    with dtype-aware sublane padding and 128-lane padding."""
    lane_td = _round_up(td, 128)
    x_row = x_itemsize * _round_up(B, _sublanes(x_itemsize)) * lane_td
    pe_row = pe_itemsize * _sublanes(pe_itemsize) * lane_td   # (1, td) pads to (sublanes, lanes)
    return 2 * x_row + pe_row


def _derive_tiles(S, B, D, x_itemsize, pe_itemsize, budget):
    """Pick (ts, td) so the double-buffered pipeline footprint fits in `budget`.
    Tiles the feature axis (multiples of 128) only when a single (B, D) row is too big."""
    td = D
    if 2 * _row_bytes(B, td, x_itemsize, pe_itemsize) > budget and D > 128:
        per_lane = 2 * (2 * x_itemsize * _round_up(B, _sublanes(x_itemsize))
                        + pe_itemsize * _sublanes(pe_itemsize))
        td = max(128, (budget // per_lane) // 128 * 128)
        td = min(td, D)
    ts = max(1, min(S, budget // (2 * _row_bytes(B, td, x_itemsize, pe_itemsize))))
    return int(ts), int(td)


def positional_encoding(x, pe_table, *, block_s=None, block_d=None, donate_x=False):
    """Forward pass. x: (S, B, D); pe_table: (max_len, 1, D) from make_pe.
    Returns x + pe[:S] (nn.Dropout is the identity at inference time).

    pe_table is handed straight to pallas_call (no wrapper-side slice/cast): the grid
    only touches its first ceil(S/ts) sequence blocks, so the unused rows cost nothing."""
    S, B, D = x.shape
    assert pe_table.shape[0] >= S and pe_table.shape[1] == 1 and pe_table.shape[2] == D
    x_itemsize = jnp.dtype(x.dtype).itemsize
    pe_itemsize = jnp.dtype(pe_table.dtype).itemsize

    vmem_cap = _vmem_capacity()
    # Pipeline footprint target: ~16 MiB on v7x (64 MiB VMEM), ~24 MiB on v5e/v6e (128 MiB).
    budget = min(vmem_cap // 4, 24 * 1024 * 1024)
    ts, td = _derive_tiles(S, B, D, x_itemsize, pe_itemsize, budget)
    if block_s is not None:
        ts = max(1, min(int(block_s), S))
    if block_d is not None:
        td = max(1, min(int(block_d), D))

    grid = (pl.cdiv(S, ts), pl.cdiv(D, td))

    # Megacore: on multi-TensorCore chips (v7x) shard the seq axis across cores with
    # CORE_PARALLEL; on single-core chips (v5e/v6e) plain PARALLEL is the safe equivalent.
    seq_sem = pltpu.CORE_PARALLEL if _num_tensorcores() > 1 else pltpu.PARALLEL
    # Explicit VMEM limit so footprints above v5e's 16 MiB scoped default still compile;
    # stays within physical VMEM on every generation.
    vmem_limit = int(min(vmem_cap, max(32 * 1024 * 1024, budget + 8 * 1024 * 1024)))

    call_kwargs = {}
    if donate_x:
        # Only alias when x is genuinely donated / dead at the jit boundary; otherwise XLA
        # inserts a defensive full-size copy that is slower than not aliasing at all.
        call_kwargs["input_output_aliases"] = {0: 0}

    out = pl.pallas_call(
        posenc_kernel,
        out_shape=jax.ShapeDtypeStruct((S, B, D), x.dtype),
        grid=grid,
        in_specs=[
            pl.BlockSpec((ts, B, td), lambda i, j: (i, 0, j)),   # x tile (lane/sublane dense)
            pl.BlockSpec((ts, 1, td), lambda i, j: (i, 0, j)),   # pe tile, batch-broadcast in-kernel
        ],
        out_specs=pl.BlockSpec((ts, B, td), lambda i, j: (i, 0, j)),
        compiler_params=pltpu.CompilerParams(
            dimension_semantics=(seq_sem, pltpu.PARALLEL),
            vmem_limit_bytes=vmem_limit,
        ),
        cost_estimate=pl.CostEstimate(
            flops=S * B * D,
            transcendentals=0,
            bytes_accessed=2 * S * B * D * x_itemsize + S * D * pe_itemsize,
        ),
        **call_kwargs,
    )(x, pe_table)

    # TODO(synk): training-mode Dropout(p=0.1) (scaled Bernoulli mask via pltpu.prng_seed /
    # pltpu.prng_random_bits fused into posenc_kernel) is not applied; this is eval semantics.
    return out


if __name__ == "__main__":
    d_model = 128
    max_len = 5000
    seq_len = 64
    batch = 8

    key = jax.random.PRNGKey(0)
    x = jax.random.normal(key, (seq_len, batch, d_model), dtype=jnp.float32)
    pe_table = make_pe(max_len, d_model)

    # Reference (kernel does not alias x by default, so order is irrelevant).
    ref = np.asarray(x + pe_table[:seq_len])

    # block_s=16 -> grid=(4, 1): exercises the tiled, double-buffered pipeline even at this
    # small demo shape.  Production calls leave block_s/block_d=None (VMEM-derived tiles).
    out = positional_encoding(x, pe_table, block_s=16)
    out = jax.block_until_ready(out)

    np.testing.assert_allclose(np.asarray(out), ref, rtol=1e-6, atol=1e-6)
    print("KERNEL_OK")
</pallas_src>

<mosaic_0001>
module attributes {stable_mosaic.version = 11 : i64} {
  func.func @posenc_kernel(%arg0: i32, %arg1: i32, %arg2: memref<16x8x128xf32, #tpu.memory_space<vmem>>, %arg3: memref<16x1x128xf32, #tpu.memory_space<vmem>>, %arg4: memref<16x8x128xf32, #tpu.memory_space<vmem>>) attributes {dimension_semantics = [#tpu.dimension_semantics<parallel>, #tpu.dimension_semantics<parallel>], iteration_bounds = array<i64: 4, 1>, scalar_prefetch = 0 : i64, scratch_operands = 0 : i64, tpu.core_type = #tpu.core_type<tc>, window_params = [{transform_indices = @transform_0, window_bounds = array<i64: 16, 8, 128>}, {transform_indices = @transform_1, window_bounds = array<i64: 16, 1, 128>}, {transform_indices = @transform_2, window_bounds = array<i64: 16, 8, 128>}]} {
    %c0 = arith.constant 0 : index
    %c0_0 = arith.constant 0 : index
    %c0_1 = arith.constant 0 : index
    %0 = vector.load %arg2[%c0, %c0_0, %c0_1] : memref<16x8x128xf32, #tpu.memory_space<vmem>>, vector<16x8x128xf32>
    %c0_2 = arith.constant 0 : index
    %c0_3 = arith.constant 0 : index
    %c0_4 = arith.constant 0 : index
    %1 = vector.load %arg3[%c0_2, %c0_3, %c0_4] : memref<16x1x128xf32, #tpu.memory_space<vmem>>, vector<16x1x128xf32>
    %2 = vector.broadcast %1 : vector<16x1x128xf32> to vector<16x8x128xf32>
    %3 = arith.addf %0, %2 : vector<16x8x128xf32>
    %c0_5 = arith.constant 0 : index
    %c0_6 = arith.constant 0 : index
    %c0_7 = arith.constant 0 : index
    %4 = vector.load %arg4[%c0_5, %c0_6, %c0_7] : memref<16x8x128xf32, #tpu.memory_space<vmem>>, vector<16x8x128xf32>
    tpu.vector_store %arg4[%c0_5, %c0_6, %c0_7], %3 {strides = array<i32>} : memref<16x8x128xf32, #tpu.memory_space<vmem>>, vector<16x8x128xf32>,
    return
  }
  func.func @transform_0(%arg0: i32, %arg1: i32) -> (i32, i32, i32) {
    %c0_i32 = arith.constant 0 : i32
    %c0_i32_0 = arith.constant 0 : i32
    return %arg0, %c0_i32, %arg1 : i32, i32, i32
  }
  func.func @transform_1(%arg0: i32, %arg1: i32) -> (i32, i32, i32) {
    %c0_i32 = arith.constant 0 : i32
    %c0_i32_0 = arith.constant 0 : i32
    return %arg0, %c0_i32, %arg1 : i32, i32, i32
  }
  func.func @transform_2(%arg0: i32, %arg1: i32) -> (i32, i32, i32) {
    %c0_i32 = arith.constant 0 : i32
    %c0_i32_0 = arith.constant 0 : i32
    return %arg0, %c0_i32, %arg1 : i32, i32, i32
  }
}

</mosaic_0001>

<bundles_post_ra>
// kernel: tpu_custom_call.1
= control target key start
LH: loop header
LB: loop body
LE: loop exit
PB: predicated region body
PF: predicated region fallthrough
CT: control target
= control target key end

     0   :  { %7 = vsyncpa [#allocation3], 0  ;;  %s957_s0 = inlined_call_operand.hbm [shape: f32[64,8,128], index: 0, kind: input, shape index: {}]   ;;  %s958_s1 = inlined_call_operand.hbm [shape: f32[5000,1,128], index: 1, kind: input, shape index: {}]   ;;  %s959_s2 = inlined_call_operand.hbm [shape: f32[64,8,128], index: 2, kind: output, shape index: {}]  }
   0x1   :  { %9 = vsyncpa [#allocation3 + $0x1], 0 }
   0x2   :  { %10 = vsyncpa [#allocation6], 0 }
   0x3   :  { %12 = vsyncpa [#allocation6 + $0x1], 0 }
   0x4   :  { %13 = vsyncpa [#allocation4], 0 }
   0x5   :  { %15 = vsyncpa [#allocation4 + $0x1], 0  ;;  %s754_s9 = smov 0   ;;  %s756_s10 = smov 0  }
   0x6   :  { %s758_s11 = smov 0   ;;  %s760_s12 = smov 0  }
   0x7   :  { %s762_s13 = smov 0   ;;  %s764_s14 = smov 0  }
   0x8 LB: > { %s474_s15 = sadd.s32 4294967295, %s730_s14   ;;  %s475_s16 = sadd.s32 4294967294, %s730_s14   ;;  %s730_s14 = sphi %s764_s14, %s21_s14   ;;  %s726_s13 = sphi %s762_s13, %s968_s13   ;;  %s722_s12 = sphi %s760_s12, %s967_s12   ;;  %s718_s11 = sphi %s758_s11, %s966_s11   ;;  %s714_s10 = sphi %s756_s10, %s965_s10   ;;  %s710_s9 = sphi %s754_s9, %s964_s9  }
   0x9   : > { %s33_s17 = sadd.s32 1, %s726_s13  ;;  %s42_s18 = sadd.s32 1, %s718_s11 }
   0xa   : > { %p35_p0 = scmp.ge.s32.totalorder %s33_s17, 4  ;;  %p49_p1 = scmp.ne.s32.totalorder %s718_s11, %s714_s10 }
   0xb   : > { %p50_p2 = scmp.eq.s32.totalorder %s730_s14, 0  ;;  %p55_p3 = scmp.ne.s32.totalorder %s714_s10, %s710_s9 }
   0xc   : > { %s970_s17 = smov (%p35_p0, %s33_s17), 0  ;;  %p56_p5 = scmp.eq.s32.totalorder %s474_s15, 0 }
   0xd   : > { %p795_p4 = por %p50_p2, %p49_p1  ;;  %s37_s20 = ssub.s32 %s726_s13, %s970_s17 }
   0xe   : > { %p109_p6 = scmp.eq.s32.totalorder %s474_s15, 3  ;;  %p40_p7 = scmp.eq.s32.totalorder %s37_s20, 0 }
   0xf   : > { %p801_p8 = por %p56_p5, %p55_p3  ;;  %p115_p10 = scmp.eq.s32.totalorder %s475_s16, 3 }
  0x10   : > { %p805_p9 = por %p109_p6, %p49_p1  ;;  %p477_p12 = scmp.ge.s32.totalorder %s730_s14, 4 }
  0x11   : > { %s810_s23 = scalar_select %p40_p7, %s718_s11, %s42_s18  }
  0x12   : > { %p812_p11 = por %p115_p10, %p55_p3  ;;  %131 = sbr.rel (%p477_p12) target bundleno = 45 (0x2d), region = 16 }
  0x13   : > { %s818_s25 = sand.u32 (!%p477_p12), 1, %s718_s11   ;;  %s493_s26 = sshll.u32 (!%p477_p12), %s726_s13, 7 }
  0x14   : > { %s478_s27 = sshll.u32 (!%p477_p12), %s818_s25, 7  ;;  %s145_s30 = scalar_lea.hbm (!%p477_p12), %s957_s0, %s493_s26 }
  0x15   : > { %s146_s3 = sshll.u32 (!%p477_p12), %s145_s30, 4  ;;  %s139_s4 = scalar_lea.vmem (!%p477_p12), [#allocation2], %s478_s27  ;;  %s147_s3 = int_to_ptr.hbm [resolvable:$true] %s146_s3 }
  0x16   : > { %s148_s5 = sshll.u32 (!%p477_p12), %s139_s4, 4  ;;  %s136_s6 = scalar_lea.sflag (!%p477_p12), [#allocation3], %s818_s25  ;;  %s149_s5 = int_to_ptr.vmem [resolvable:$true] %s148_s5 }
  0x17   : > { %s732_s7 = smov 128   ;;  %s733_s8 = smov 8  }
  0x18   : > { %495 = dma.hbm_to_vmem [thread:$0]  (%p795_p4), %s147_s3, 2048, %s149_s5, %s136_s6, %s732_s7, %s732_s7, %s733_s8  }
  0x19   : > { %157 = sbr.rel (!%p795_p4) target bundleno = 45 (0x2d), region = 24  ;;  %s481_s15 = sshll.u32 (%p795_p4), %s818_s25, 4 }
  0x1a   : > { %s482_s16 = sshll.u32 (%p795_p4), %s726_s13, 4  ;;  %s159_s18 = scalar_lea.sflag (%p795_p4), [#allocation6], %s818_s25 }
  0x1b   : > { %s162_s20 = scalar_lea.vmem (%p795_p4), [#allocation5], %s481_s15  ;;  %s172_s28 = scalar_lea.hbm (%p795_p4), %s958_s1, %s482_s16 }
  0x1c   : > { %s173_s29 = sshll.u32 (%p795_p4), %s172_s28, 4  ;;  %s175_s30 = sshll.u32 (%p795_p4), %s162_s20, 4  ;;  %s174_s29 = int_to_ptr.hbm [resolvable:$true] %s173_s29  ;;  %s176_s30 = int_to_ptr.vmem [resolvable:$true] %s175_s30 }
  0x1d   : > { %s603_s4 = sshra.s32 (%p795_p4), %s174_s29, 4  ;;  %s614_s6 = scalar_lea.hbm (%p795_p4), %s958_s1, 5000  ;;  %s604_s4 = int_to_ptr.hbm [resolvable:$true] %s603_s4 }
  0x1e   : > { %s610_s3 = scalar_lea.hbm %s604_s4, 16 }
  0x1f   : > { %p611_p13 = scmp.ne.s32.totalorder %s604_s4, %s610_s3  ;;  %p616_p0 = scmp.lt.s32.totalorder %s614_s6, %s610_s3 }
  0x21   : > { %p618_p1 = pnand %p616_p0, %p611_p13 }
  0x23   : > { %621 = shalt.err (!%p618_p1)
}
  0x24   : > { %s622_s7 = sshra.s32 %s176_s30, 4  ;;  %s734_s15 = smov [#allocation5]   ;;  %s623_s7 = int_to_ptr.vmem [resolvable:$true] %s622_s7 }
  0x25   : > { %s629_s8 = scalar_lea.vmem %s623_s7, 16  ;;  %s633_s16 = scalar_lea.vmem %s734_s15, 32 }
  0x26   : > { %p630_p2 = scmp.ne.s32.totalorder %s623_s7, %s629_s8  ;;  %p635_p3 = scmp.lt.s32.totalorder %s633_s16, %s629_s8 }
  0x28   : > { %p637_p4 = pnand %p635_p3, %p630_p2 }
  0x2a   : > { %640 = shalt.err (!%p637_p4)
}
  0x2b   : > { %s735_s20 = smov 16   ;;  %s736_s26 = smov 1  }
  0x2c   : > { %181 = dma.hbm_to_vmem [thread:$0]  %s174_s29, 256, %s176_s30, %s159_s18, %s735_s20, %s735_s20, %s736_s26  }
  0x2d PF: > { %p484_p5 = scmp.ge.s32.totalorder %s730_s14, 1  ;;  %p183_p6 = scmp.lt.s32.totalorder %s730_s14, 5 }
  0x2f   : > { %p184_p7 = pnand %p484_p5, %p183_p6 }
  0x30   : > { %s844_s27 = sand.u32 (!%p184_p7), 1, %s714_s10  }
  0x31   : > { %187 = sbr.rel (%p184_p7) target bundleno = 81 (0x51), region = 28  ;;  %s485_s28 = sshll.u32 (!%p184_p7), %s844_s27, 7 }
  0x32   : > { %s190_s4 = scalar_lea.sflag (!%p184_p7), [#allocation3], %s844_s27  ;;  %s848_s3 = scalar_lea.vmem (!%p184_p7), [#allocation2], %s485_s28 }
  0x36   : > { %695 = dma.done.wait (%p801_p8), %s190_s4, 2048  }
  0x37   : > { %697 = vsyncadd (%p801_p8), %s190_s4, 4294965248  ;;  %s486_s25 = sshll.u32 %s844_s27, 4  ;;  %s200_s18 = scalar_lea.sflag [#allocation6], %s844_s27 }
  0x38   : > { %s856_s29 = scalar_lea.vmem [#allocation5], %s486_s25 }
  0x39   : > { %699 = dma.done.wait (%p801_p8), %s200_s18, 256  }
  0x3a   : > { %701 = vsyncadd (%p801_p8), %s200_s18, 4294967040  ;;  %s494_s30 = sshll.u32 %s722_s12, 7  ;;  %v236_v0 = vld [vmem:[%s848_s3] sm:$0xff]  ;;  %v237_v2 = vld [vmem:[%s848_s3 + $0x8] sm:$0xff]  ;;  %s876_s12 = scalar_lea.vmem [#allocation7], %s485_s28 }
  0x3b   : > { %v559_v1 = vld [vmem:[%s856_s29] ss:$0 sm:$0xff]  ;;  %v560_v3 = vld [vmem:[%s856_s29 + $0x1] ss:$0 sm:$0xff]  ;;  %s870_s21 = scalar_lea.hbm %s959_s2, %s494_s30  ;;  %v561_v6 = vld [vmem:[%s856_s29 + $0x2] ss:$0 sm:$0xff] }
  0x3c   : > { %v316_v4 = vadd.f32 %v559_v1, %v236_v0  ;;  %v238_v5 = vld [vmem:[%s848_s3 + $0x10] sm:$0xff]  ;;  %v317_v7 = vadd.f32 %v560_v3, %v237_v2  ;;  %v239_v8 = vld [vmem:[%s848_s3 + $0x18] sm:$0xff]  ;;  %s362_s6 = sshll.u32 %s876_s12, 4  ;;  %v240_v11 = vld [vmem:[%s848_s3 + $0x20] sm:$0xff]  ;;  %s364_s7 = sshll.u32 %s870_s21, 4  ;;  %s363_s6 = int_to_ptr.vmem [resolvable:$true] %s362_s6  ;;  %s365_s7 = int_to_ptr.hbm [resolvable:$true] %s364_s7 }
  0x3d   : > { %v562_v9 = vld [vmem:[%s856_s29 + $0x3] ss:$0 sm:$0xff]  ;;  %v318_v10 = vadd.f32 %v561_v6, %v238_v5  ;;  %v563_v12 = vld [vmem:[%s856_s29 + $0x4] ss:$0 sm:$0xff]  ;;  %v241_v14 = vld [vmem:[%s848_s3 + $0x28] sm:$0xff]  ;;  %s349_s8 = scalar_lea.sflag [#allocation4], %s844_s27 }
  0x3e   : > { %332 = vst [vmem:[%s876_s12] sm:$0xff] %v316_v4  ;;  %v319_v13 = vadd.f32 %v562_v9, %v239_v8  ;;  %v564_v15 = vld [vmem:[%s856_s29 + $0x5] ss:$0 sm:$0xff]  ;;  %v320_v16 = vadd.f32 %v563_v12, %v240_v11  ;;  %v565_v18 = vld [vmem:[%s856_s29 + $0x6] ss:$0 sm:$0xff]  ;;  %v243_v20 = vld [vmem:[%s848_s3 + $0x38] sm:$0xff]  ;;  %s656_s15 = sshra.s32 %s365_s7, 4  ;;  %s657_s15 = int_to_ptr.hbm [resolvable:$true] %s656_s15 }
  0x3f   : > { %333 = vst [vmem:[%s876_s12 + $0x8] sm:$0xff] %v317_v7  ;;  %v242_v17 = vld [vmem:[%s848_s3 + $0x30] sm:$0xff]  ;;  %v321_v19 = vadd.f32 %v564_v15, %v241_v14  ;;  %v244_v23 = vld [vmem:[%s848_s3 + $0x40] sm:$0xff]  ;;  %v567_v24 = vld [vmem:[%s856_s29 + $0x8] ss:$0 sm:$0xff]  ;;  %s658_s16 = scalar_lea.hbm %s657_s15, 128  ;;  %p663_p13 = scmp.lt.s32.totalorder %s657_s15, %s959_s2 }
  0x40   : > { %334 = vst [vmem:[%s876_s12 + $0x10] sm:$0xff] %v318_v10  ;;  %v566_v21 = vld [vmem:[%s856_s29 + $0x7] ss:$0 sm:$0xff]  ;;  %v322_v22 = vadd.f32 %v565_v18, %v242_v17  ;;  %v245_v26 = vld [vmem:[%s848_s3 + $0x48] sm:$0xff]  ;;  %v324_v28 = vadd.f32 %v567_v24, %v244_v23  ;;  %v247_v32 = vld [vmem:[%s848_s3 + $0x58] sm:$0xff]  ;;  %p659_p8 = scmp.ne.s32.totalorder %s657_s15, %s658_s16  ;;  %s662_s28 = scalar_lea.hbm %s959_s2, 512 }
  0x41   : > { %335 = vst [vmem:[%s876_s12 + $0x18] sm:$0xff] %v319_v13  ;;  %v323_v25 = vadd.f32 %v566_v21, %v243_v20  ;;  %v568_v27 = vld [vmem:[%s856_s29 + $0x9] ss:$0 sm:$0xff]  ;;  %v246_v29 = vld [vmem:[%s848_s3 + $0x50] sm:$0xff]  ;;  %v569_v30 = vld [vmem:[%s856_s29 + $0xa] ss:$0 sm:$0xff]  ;;  %p664_p0 = scmp.lt.s32.totalorder %s662_s28, %s658_s16 }
  0x42   : > { %336 = vst [vmem:[%s876_s12 + $0x20] sm:$0xff] %v320_v16  ;;  %v325_v31 = vadd.f32 %v568_v27, %v245_v26  ;;  %v570_v33 = vld [vmem:[%s856_s29 + $0xb] ss:$0 sm:$0xff]  ;;  %v326_v34 = vadd.f32 %v569_v30, %v246_v29  ;;  %v248_v35 = vld [vmem:[%s848_s3 + $0x60] sm:$0xff]  ;;  %v571_v36 = vld [vmem:[%s856_s29 + $0xc] ss:$0 sm:$0xff]  ;;  %p660_p10 = pnand %p659_p8, %p805_p9 }
  0x43   : > { %337 = vst [vmem:[%s876_s12 + $0x28] sm:$0xff] %v321_v19  ;;  %v327_v37 = vadd.f32 %v570_v33, %v247_v32  ;;  %v249_v38 = vld [vmem:[%s848_s3 + $0x68] sm:$0xff]  ;;  %v328_v40 = vadd.f32 %v571_v36, %v248_v35  ;;  %v250_v41 = vld [vmem:[%s848_s3 + $0x70] sm:$0xff]  ;;  %v251_v44 = vld [vmem:[%s848_s3 + $0x78] sm:$0xff]  ;;  %p665_p1 = por %p664_p0, %p663_p13 }
  0x44   : > { %338 = vst [vmem:[%s876_s12 + $0x30] sm:$0xff] %v322_v22  ;;  %v572_v39 = vld [vmem:[%s856_s29 + $0xd] ss:$0 sm:$0xff]  ;;  %v573_v42 = vld [vmem:[%s856_s29 + $0xe] ss:$0 sm:$0xff]  ;;  %p661_p12 = pneg %p660_p10 }
  0x45   : > { %339 = vst [vmem:[%s876_s12 + $0x38] sm:$0xff] %v323_v25  ;;  %v329_v43 = vadd.f32 %v572_v39, %v249_v38  ;;  %v574_v45 = vld [vmem:[%s856_s29 + $0xf] ss:$0 sm:$0xff]  ;;  %v330_v46 = vadd.f32 %v573_v42, %v250_v41 }
  0x46   : > { %340 = vst [vmem:[%s876_s12 + $0x40] sm:$0xff] %v324_v28  ;;  %v331_v47 = vadd.f32 %v574_v45, %v251_v44  ;;  %p666_p2 = pnand %p665_p1, %p661_p12 }
  0x47   : > { %341 = vst [vmem:[%s876_s12 + $0x48] sm:$0xff] %v325_v31 }
  0x48   : > { %342 = vst [vmem:[%s876_s12 + $0x50] sm:$0xff] %v326_v34 }
  0x49   : > { %343 = vst [vmem:[%s876_s12 + $0x58] sm:$0xff] %v327_v37 }
  0x4a   : > { %344 = vst [vmem:[%s876_s12 + $0x60] sm:$0xff] %v328_v40 }
  0x4b   : > { %345 = vst [vmem:[%s876_s12 + $0x68] sm:$0xff] %v329_v43 }
  0x4c   : > { %346 = vst [vmem:[%s876_s12 + $0x70] sm:$0xff] %v330_v46 }
  0x4d   : > { %347 = vst [vmem:[%s876_s12 + $0x78] sm:$0xff] %v331_v47 }
  0x4e   : > { %669 = shalt.err (!%p666_p2)
}
  0x4f   : > { %s737_s27 = smov 128   ;;  %s738_s25 = smov 8  }
  0x50   : > { %498 = dma.vmem_to_hbm [thread:$0]  (%p805_p9), %s363_s6, 2048, %s365_s7, %s349_s8, %s737_s27, %s737_s27, %s738_s25  }
  0x51 PF: > { %p504_p3 = scmp.ge.s32.totalorder %s730_s14, 2  ;;  %s379_s18 = sand.u32 1, %s710_s9  }
  0x52   : > { %s380_s29 = scalar_lea.sflag [#allocation4], %s379_s18 }
  0x53   : > { %p501_p4 = pnand %p504_p3, %p812_p11 }
  0x55   : > { %p502_p5 = pneg %p501_p4 }
  0x57   : > { %703 = dma.done.wait (%p502_p5), %s380_s29, 2048  }
  0x58   : > { %705 = vsyncadd (%p502_p5), %s380_s29, 4294965248  ;;  %s21_s14 = sadd.s32 1, %s730_s14   ;;  %s964_s9 = smov %s714_s10 }
  0x59   : > { %p18_p6 = scmp.ge.s32.totalorder %s21_s14, 6   ;;  %s965_s10 = smov %s718_s11 }
  0x5a   : > { %s966_s11 = smov %s810_s23  ;;  %s967_s12 = smov %s726_s13 }
  0x5b   : > { %s968_s13 = smov %s970_s17  ;;  %20 = sbr.rel (!%p18_p6) target bundleno = 8 (0x8), region = 86 }
  0x60   :  { %386 = vsyncpa [#allocation3], 1 }
  0x61   :  { %388 = vsyncpa [#allocation3 + $0x1], 1 }
  0x62   :  { %389 = vsyncpa [#allocation6], 1 }
  0x63   :  { %391 = vsyncpa [#allocation6 + $0x1], 1 }
  0x64   :  { %392 = vsyncpa [#allocation4], 1 }
  0x65   :  { %394 = vsyncpa [#allocation4 + $0x1], 1 }

</bundles_post_ra>
